<compile_context>
chip_gen: v7x
topology: tpu7x:2x2x1
jax: 0.10.0
libtpu: 0.0.40
codegen_flags: <defaults>
</compile_context>

<pallas_src>
import functools

import jax
import jax.numpy as jnp
from jax.experimental import pallas as pl
from jax.experimental.pallas import tpu as pltpu


# ----------------------------------------------------------------------------
# Kernel: LayerNorm over the channel axis of a (B, C, TILE_HW) block.
# ----------------------------------------------------------------------------
def _layernorm_kernel(x_ref, w_ref, b_ref, o_ref, *, with_bias, eps, inv_c):
    x = x_ref[...]                                         # (B, C, T) f32, lanes = T
    mu = jnp.sum(x, axis=1, keepdims=True) * inv_c         # (B, 1, T) sublane reduce
    xc = x - mu
    var = jnp.sum(xc * xc, axis=1, keepdims=True) * inv_c  # unbiased=False variance
    inv = jax.lax.rsqrt(var + eps)                         # EUP
    w = w_ref[...][None, :, :]                             # (1, C, 1) per-channel scale
    if with_bias:
        b = b_ref[...][None, :, :]
        o_ref[...] = xc * inv * w + b                      # WithBias_LayerNorm
    else:
        o_ref[...] = x * inv * w                           # BiasFree_LayerNorm


# ----------------------------------------------------------------------------
# Spatial tile picker: full extent when small, otherwise the largest
# multiple-of-128 divisor of H*W (keeps blocks lane-aligned and VMEM-bounded).
# ----------------------------------------------------------------------------
def _pick_tile_hw(hw, max_tile=2048):
    if hw <= max_tile or hw % 128 != 0:
        return hw                       # full-extent block (always legal)
    t = max_tile - (max_tile % 128)
    while t >= 128:
        if hw % t == 0:
            return t
        t -= 128
    return hw


# ----------------------------------------------------------------------------
# Forward wrapper: x is NCHW (B, C, H, W), like the PyTorch module.
# bias=None  -> BiasFree_LayerNorm;  bias given -> WithBias_LayerNorm.
# ----------------------------------------------------------------------------
def layernorm_nchw(x, weight, bias=None, *, eps=1e-5, max_tile_hw=2048):
    B, C, H, W = x.shape
    HW = H * W
    with_bias = bias is not None

    x3 = x.reshape(B, C, HW).astype(jnp.float32)           # free reshape (NCHW order)
    w2 = weight.astype(jnp.float32).reshape(C, 1)
    b_arr = bias if with_bias else jnp.zeros((C,), jnp.float32)
    b2 = b_arr.astype(jnp.float32).reshape(C, 1)

    tile = _pick_tile_hw(HW, max_tile_hw)
    grid = (HW // tile,)

    kernel = functools.partial(
        _layernorm_kernel, with_bias=with_bias, eps=eps, inv_c=1.0 / C)

    out = pl.pallas_call(
        kernel,
        out_shape=jax.ShapeDtypeStruct((B, C, HW), jnp.float32),
        grid=grid,
        in_specs=[
            pl.BlockSpec((B, C, tile), lambda i: (0, 0, i)),   # activations, lane = HW
            pl.BlockSpec((C, 1), lambda i: (0, 0)),            # per-channel weight
            pl.BlockSpec((C, 1), lambda i: (0, 0)),            # per-channel bias
        ],
        out_specs=pl.BlockSpec((B, C, tile), lambda i: (0, 0, i)),
        compiler_params=pltpu.CompilerParams(
            dimension_semantics=("parallel",)),                # pixels are independent
    )(x3, w2, b2)

    return out.reshape(B, C, H, W)


# ----------------------------------------------------------------------------
# Pure-JAX reference (mirrors the PyTorch code: to_3d -> norm over C -> to_4d).
# ----------------------------------------------------------------------------
def layernorm_ref(x, weight, bias=None, eps=1e-5):
    B, C, H, W = x.shape
    x3 = x.reshape(B, C, H * W).transpose(0, 2, 1)          # (B, HW, C)
    mu = jnp.mean(x3, axis=-1, keepdims=True)
    var = jnp.mean((x3 - mu) ** 2, axis=-1, keepdims=True)
    if bias is not None:
        y = (x3 - mu) / jnp.sqrt(var + eps) * weight + bias
    else:
        y = x3 / jnp.sqrt(var + eps) * weight
    return y.transpose(0, 2, 1).reshape(B, C, H, W)


# ----------------------------------------------------------------------------
# Main
# ----------------------------------------------------------------------------
if __name__ == "__main__":
    B, C, H, W = 2, 4, 16, 16

    key = jax.random.PRNGKey(0)
    kx, kw, kb = jax.random.split(key, 3)
    x = jax.random.normal(kx, (B, C, H, W), jnp.float32)          # NCHW, like PyTorch
    weight = 1.0 + 0.1 * jax.random.normal(kw, (C,), jnp.float32)
    bias = 0.1 * jax.random.normal(kb, (C,), jnp.float32)

    # WithBias_LayerNorm
    out_wb = jax.block_until_ready(layernorm_nchw(x, weight, bias))
    assert out_wb.shape == (B, C, H, W)
    assert jnp.allclose(out_wb, layernorm_ref(x, weight, bias), atol=1e-5, rtol=1e-5)

    # BiasFree_LayerNorm
    out_bf = jax.block_until_ready(layernorm_nchw(x, weight, None))
    assert out_bf.shape == (B, C, H, W)
    assert jnp.allclose(out_bf, layernorm_ref(x, weight, None), atol=1e-5, rtol=1e-5)

    print("KERNEL_OK")
</pallas_src>

<mosaic_0001>
module attributes {stable_mosaic.version = 11 : i64} {
  func.func @_layernorm_kernel(%arg0: i32, %arg1: memref<2x4x256xf32, #tpu.memory_space<vmem>>, %arg2: memref<4x1xf32, #tpu.memory_space<vmem>>, %arg3: memref<4x1xf32, #tpu.memory_space<vmem>>, %arg4: memref<2x4x256xf32, #tpu.memory_space<vmem>>) attributes {dimension_semantics = [#tpu.dimension_semantics<parallel>], iteration_bounds = array<i64: 1>, scalar_prefetch = 0 : i64, scratch_operands = 0 : i64, tpu.core_type = #tpu.core_type<tc>, window_params = [{transform_indices = @transform_0, window_bounds = array<i64: 2, 4, 256>}, {pipeline_mode = #tpu.pipeline_mode<synchronous>, transform_indices = @transform_1, window_bounds = array<i64: 4, 1>}, {pipeline_mode = #tpu.pipeline_mode<synchronous>, transform_indices = @transform_2, window_bounds = array<i64: 4, 1>}, {transform_indices = @transform_3, window_bounds = array<i64: 2, 4, 256>}]} {
    %c0 = arith.constant 0 : index
    %c0_0 = arith.constant 0 : index
    %c0_1 = arith.constant 0 : index
    %0 = vector.load %arg1[%c0, %c0_0, %c0_1] : memref<2x4x256xf32, #tpu.memory_space<vmem>>, vector<2x4x256xf32>
    %cst = arith.constant dense<0.000000e+00> : vector<2x256xf32>
    %1 = vector.multi_reduction <add>, %0, %cst [1] : vector<2x4x256xf32> to vector<2x256xf32>
    %2 = vector.shape_cast %1 : vector<2x256xf32> to vector<2x1x256xf32>
    %cst_2 = arith.constant 2.500000e-01 : f32
    %3 = vector.broadcast %cst_2 : f32 to vector<2x1x256xf32>
    %4 = arith.mulf %2, %3 : vector<2x1x256xf32>
    %5 = vector.broadcast %4 : vector<2x1x256xf32> to vector<2x4x256xf32>
    %6 = arith.subf %0, %5 : vector<2x4x256xf32>
    %7 = arith.mulf %6, %6 : vector<2x4x256xf32>
    %cst_3 = arith.constant dense<0.000000e+00> : vector<2x256xf32>
    %8 = vector.multi_reduction <add>, %7, %cst_3 [1] : vector<2x4x256xf32> to vector<2x256xf32>
    %9 = vector.shape_cast %8 : vector<2x256xf32> to vector<2x1x256xf32>
    %cst_4 = arith.constant 2.500000e-01 : f32
    %10 = vector.broadcast %cst_4 : f32 to vector<2x1x256xf32>
    %11 = arith.mulf %9, %10 : vector<2x1x256xf32>
    %cst_5 = arith.constant 9.99999974E-6 : f32
    %12 = vector.broadcast %cst_5 : f32 to vector<2x1x256xf32>
    %13 = arith.addf %11, %12 : vector<2x1x256xf32>
    %14 = math.rsqrt %13 : vector<2x1x256xf32>
    %c0_6 = arith.constant 0 : index
    %c0_7 = arith.constant 0 : index
    %15 = vector.load %arg2[%c0_6, %c0_7] : memref<4x1xf32, #tpu.memory_space<vmem>>, vector<4x1xf32>
    %16 = vector.shape_cast %15 : vector<4x1xf32> to vector<1x4x1xf32>
    %c0_8 = arith.constant 0 : index
    %c0_9 = arith.constant 0 : index
    %17 = vector.load %arg3[%c0_8, %c0_9] : memref<4x1xf32, #tpu.memory_space<vmem>>, vector<4x1xf32>
    %18 = vector.shape_cast %17 : vector<4x1xf32> to vector<1x4x1xf32>
    %19 = vector.broadcast %14 : vector<2x1x256xf32> to vector<2x4x256xf32>
    %20 = arith.mulf %6, %19 : vector<2x4x256xf32>
    %21 = vector.broadcast %16 : vector<1x4x1xf32> to vector<2x4x256xf32>
    %22 = arith.mulf %20, %21 : vector<2x4x256xf32>
    %23 = vector.broadcast %18 : vector<1x4x1xf32> to vector<2x4x256xf32>
    %24 = arith.addf %22, %23 : vector<2x4x256xf32>
    %c0_10 = arith.constant 0 : index
    %c0_11 = arith.constant 0 : index
    %c0_12 = arith.constant 0 : index
    %25 = vector.load %arg4[%c0_10, %c0_11, %c0_12] : memref<2x4x256xf32, #tpu.memory_space<vmem>>, vector<2x4x256xf32>
    tpu.vector_store %arg4[%c0_10, %c0_11, %c0_12], %24 {strides = array<i32>} : memref<2x4x256xf32, #tpu.memory_space<vmem>>, vector<2x4x256xf32>,
    return
  }
  func.func @transform_0(%arg0: i32) -> (i32, i32, i32) {
    %c0_i32 = arith.constant 0 : i32
    %c0_i32_0 = arith.constant 0 : i32
    %c0_i32_1 = arith.constant 0 : i32
    return %c0_i32, %c0_i32_0, %arg0 : i32, i32, i32
  }
  func.func @transform_1(%arg0: i32) -> (i32, i32) {
    %c0_i32 = arith.constant 0 : i32
    %c0_i32_0 = arith.constant 0 : i32
    %c0_i32_1 = arith.constant 0 : i32
    return %c0_i32, %c0_i32_0 : i32, i32
  }
  func.func @transform_2(%arg0: i32) -> (i32, i32) {
    %c0_i32 = arith.constant 0 : i32
    %c0_i32_0 = arith.constant 0 : i32
    %c0_i32_1 = arith.constant 0 : i32
    return %c0_i32, %c0_i32_0 : i32, i32
  }
  func.func @transform_3(%arg0: i32) -> (i32, i32, i32) {
    %c0_i32 = arith.constant 0 : i32
    %c0_i32_0 = arith.constant 0 : i32
    %c0_i32_1 = arith.constant 0 : i32
    return %c0_i32, %c0_i32_0, %arg0 : i32, i32, i32
  }
}

</mosaic_0001>

<bundles_post_ra>
// kernel: tpu_custom_call.1
= control target key start
LH: loop header
LB: loop body
LE: loop exit
PB: predicated region body
PF: predicated region fallthrough
CT: control target
= control target key end

     0   :  { %8 = vsyncpa [#allocation3], 0  ;;  %s322_s0 = inlined_call_operand.hbm [shape: f32[2,4,256], index: 0, kind: input, shape index: {}]   ;;  %s323_s1 = inlined_call_operand.vmem [shape: f32[4,1], index: 1, kind: input, shape index: {}]   ;;  %s324_s2 = inlined_call_operand.vmem [shape: f32[4,1], index: 2, kind: input, shape index: {}]   ;;  %s325_s3 = inlined_call_operand.hbm [shape: f32[2,4,256], index: 3, kind: output, shape index: {}]  }
   0x1   :  { %9 = vsyncpa [#allocation4], 0  ;;  %s252_s12 = smov [#allocation2]   ;;  %s204_s16 = scalar_lea.hbm %s322_s0, 256 }
   0x2   :  { %s15_s13 = sshll.u32 %s252_s12, 4  ;;  %p205_p0 = scmp.ne.s32.totalorder %s322_s0, %s204_s16  ;;  %s16_s13 = int_to_ptr.vmem [resolvable:$true] %s15_s13 }
   0x3   :  { %p208_p1 = scmp.lt.u32.totalorder %s204_s16, %s322_s0 }
   0x5   :  { %p210_p2 = pnand %p208_p1, %p205_p0 }
   0x7   :  { %213 = shalt.err (!%p210_p2)
}
   0x8   :  { %s214_s21 = scalar_lea.vmem %s16_s13, 256  ;;  %p219_p4 = scmp.lt.s32.totalorder %s16_s13, %s16_s13 }
   0x9   :  { %p215_p3 = scmp.ne.s32.totalorder %s16_s13, %s214_s21  ;;  %p220_p5 = scmp.lt.s32.totalorder %s214_s21, %s214_s21 }
   0xb   :  { %p221_p6 = por %p220_p5, %p219_p4 }
   0xd   :  { %p222_p7 = pnand %p221_p6, %p215_p3 }
   0xf   :  { %225 = shalt.err (!%p222_p7)
}
  0x10   :  { %s253_s22 = smov 128   ;;  %s254_s23 = smov 8  }
  0x11   :  { %21 = dma.hbm_to_vmem [thread:$0]  %s322_s0, 256, %s16_s13, [#allocation3], %s253_s22, %s253_s22, %s254_s23  }
  0x12   :  { %248 = dma.done.wait [#allocation3], 256  }
  0x13   :  { %249 = vsyncadd [#allocation3], 4294967040  ;;  %v255_v0 = vmov 0   ;;  %v128_v1 = vld [vmem:[%s323_s1] sm:$0xf]  ;;  %v30_v4 = vld [vmem:[#allocation2 + $0x8] sm:$0xff] }
  0x14   :  { %193 = vset.pattern.permute.xlu0 %v255_v0  ;;  %v129_v2 = vld [vmem:[%s324_s2] sm:$0xf]  ;;  %vm37_vm0 = vcmask 1043456   ;;  %v34_v6 = vcombine.high %v30_v4, %v30_v4  ;;  %s257_s0 = smov [#allocation5]  }
  0x15   :  { %142 = vperm.xlu0 %193, %v128_v1   ;;  %v29_v3 = vld [vmem:[#allocation2] sm:$0xff]  ;;  %v52_v9 = vsel %vm37_vm0, %v30_v4, 0.0  ;;  %s175_s1 = sshll.u32 %s257_s0, 4  ;;  %s176_s1 = int_to_ptr.vmem [resolvable:$true] %s175_s1 }
  0x16   :  { %v33_v5 = vcombine.high %v29_v3, %v29_v3  ;;  %v38_v7 = vsel %vm37_vm0, %v29_v3, 0.0  ;;  %v59_v10 = vsel %vm37_vm0, %v34_v6, 0.0  ;;  %v53_v13 = vrot.slane %v52_v9, 4  ;;  %s226_s2 = scalar_lea.vmem %s176_s1, 256  ;;  %p231_p9 = scmp.lt.s32.totalorder %s176_s1, %s176_s1 }
  0x17   :  { %v39_v11 = vrot.slane %v38_v7, 4  ;;  %v60_v14 = vrot.slane %v59_v10, 4  ;;  %p227_p8 = scmp.ne.s32.totalorder %s176_s1, %s226_s2  ;;  %p232_p10 = scmp.lt.s32.totalorder %s226_s2, %s226_s2 }
  0x18   :  { %v45_v8 = vsel %vm37_vm0, %v33_v5, 0.0  ;;  %v54_v17 = vadd.f32 %v53_v13, %v52_v9 }
  0x19   :  { %156 = vperm.xlu0 %193, %v129_v2   ;;  %v46_v12 = vrot.slane %v45_v8, 4  ;;  %v40_v15 = vadd.f32 %v39_v11, %v38_v7  ;;  %v61_v18 = vadd.f32 %v60_v14, %v59_v10  ;;  %p233_p11 = por %p232_p10, %p231_p9 }
  0x1a   :  { %v55_v21 = vrot.slane %v54_v17, 2 }
  0x1b   :  { %v47_v16 = vadd.f32 %v46_v12, %v45_v8  ;;  %v41_v19 = vrot.slane %v40_v15, 2  ;;  %v62_v22 = vrot.slane %v61_v18, 2  ;;  %p234_p12 = pnand %p233_p11, %p227_p8 }
  0x1c   :  { %v56_v25 = vadd.f32 %v55_v21, %v54_v17  ;;  %v147_v21 = vlaneseq }
  0x1d   :  { %v48_v20 = vrot.slane %v47_v16, 2  ;;  %v42_v23 = vadd.f32 %v41_v19, %v40_v15  ;;  %v63_v26 = vadd.f32 %v62_v22, %v61_v18  ;;  %v256_v19 = vmov 839922192  }
  0x1e   :  { %v57_v29 = vrot.slane %v56_v25, 1 }
  0x1f   :  { %v49_v24 = vadd.f32 %v48_v20, %v47_v16  ;;  %v43_v27 = vrot.slane %v42_v23, 1  ;;  %v64_v30 = vrot.slane %v63_v26, 1  ;;  %v145_v20 = vunpack.c.l.s4 %v256_v19 }
  0x20   :  { %v58_v33 = vadd.f32 %v57_v29, %v56_v25 }
  0x21   :  { %v50_v28 = vrot.slane %v49_v24, 1  ;;  %v44_v31 = vadd.f32 %v43_v27, %v42_v23  ;;  %v65_v34 = vadd.f32 %v64_v30, %v63_v26  ;;  %v146_v25 = vunpack.c.0.s8 %v145_v20 }
  0x22   :  { %v68_v37 = vmul.f32 0.25, %v58_v33  ;;  %v148_v26 = vshrl.u32 %v147_v21, 7 }
  0x23   :  { %v51_v32 = vadd.f32 %v50_v28, %v49_v24  ;;  %v66_v35 = vmul.f32 0.25, %v44_v31  ;;  %v69_v38 = vmul.f32 0.25, %v65_v34 }
  0x24   :  { %v149_v28 = vsub.s32 %v146_v25, %v148_v26 }
  0x25   :  { %v67_v36 = vmul.f32 0.25, %v51_v32  ;;  %v75_v40 = vcombine.low %v68_v37, %v69_v38 }
  0x27   :  { %v74_v39 = vcombine.low %v66_v35, %v67_v36  ;;  %v79_v42 = vsub.f32 %v30_v4, %v75_v40 }
  0x29   :  { %v78_v41 = vsub.f32 %v29_v3, %v74_v39  ;;  %v81_v44 = vmul.f32 %v79_v42, %v79_v42 }
  0x2b   :  { %v80_v43 = vmul.f32 %v78_v41, %v78_v41  ;;  %v85_v46 = vcombine.high %v81_v44, %v81_v44  ;;  %v102_v48 = vsel %vm37_vm0, %v81_v44, 0.0 }
  0x2c   :  { %v103_v52 = vrot.slane %v102_v48, 4 }
  0x2d   :  { %v84_v45 = vcombine.high %v80_v43, %v80_v43  ;;  %v88_v47 = vsel %vm37_vm0, %v80_v43, 0.0  ;;  %v109_v51 = vsel %vm37_vm0, %v85_v46, 0.0 }
  0x2e   :  { %v89_v50 = vrot.slane %v88_v47, 4  ;;  %v110_v54 = vrot.slane %v109_v51, 4  ;;  %v104_v56 = vadd.f32 %v103_v52, %v102_v48 }
  0x2f   :  { %v95_v49 = vsel %vm37_vm0, %v84_v45, 0.0 }
  0x30   :  { %v96_v53 = vrot.slane %v95_v49, 4  ;;  %v90_v55 = vadd.f32 %v89_v50, %v88_v47  ;;  %v111_v58 = vadd.f32 %v110_v54, %v109_v51  ;;  %v105_v60 = vrot.slane %v104_v56, 2 }
  0x32   :  { %v97_v57 = vadd.f32 %v96_v53, %v95_v49  ;;  %v91_v59 = vrot.slane %v90_v55, 2  ;;  %v112_v62 = vrot.slane %v111_v58, 2  ;;  %v106_v0 = vadd.f32 %v105_v60, %v104_v56 }
  0x34   :  { %v98_v61 = vrot.slane %v97_v57, 2  ;;  %v92_v63 = vadd.f32 %v91_v59, %v90_v55  ;;  %v113_v2 = vadd.f32 %v112_v62, %v111_v58  ;;  %v107_v4 = vrot.slane %v106_v0, 1 }
  0x36   :  { %v99_v1 = vadd.f32 %v98_v61, %v97_v57  ;;  %v93_v3 = vrot.slane %v92_v63, 1  ;;  %v114_v6 = vrot.slane %v113_v2, 1  ;;  %v108_v8 = vadd.f32 %v107_v4, %v106_v0 }
  0x38   :  { %v100_v5 = vrot.slane %v99_v1, 1  ;;  %v94_v7 = vadd.f32 %v93_v3, %v92_v63  ;;  %v115_v10 = vadd.f32 %v114_v6, %v113_v2  ;;  %v118_v12 = vmul.f32 0.25, %v108_v8 }
  0x3a   :  { %v101_v9 = vadd.f32 %v100_v5, %v99_v1  ;;  %v116_v11 = vmul.f32 0.25, %v94_v7  ;;  %v119_v14 = vmul.f32 0.25, %v115_v10  ;;  %v122_v16 = vadd.f32 1e-05, %v118_v12 }
  0x3c   :  { %v117_v13 = vmul.f32 0.25, %v101_v9  ;;  %v120_v15 = vadd.f32 1e-05, %v116_v11  ;;  %v123_v18 = vadd.f32 1e-05, %v119_v14 }
  0x3e   :  { %v121_v17 = vadd.f32 1e-05, %v117_v13  ;;  %196 = vrsqrt.f32 %v120_v15 }
  0x3f   :  { %198 = vrsqrt.f32 %v122_v16 }
  0x40   :  { %200 = vrsqrt.f32 %v121_v17 }
  0x41   :  { %202 = vrsqrt.f32 %v123_v18 }
  0x48   :  { %v197_v22 = vpop.eup %196 }
  0x49   :  { %v199_v23 = vpop.eup %198 }
  0x4a   :  { %v201_v24 = vpop.eup %200 }
  0x4b   :  { %v203_v27 = vpop.eup %202  ;;  %v134_v29 = vcombine.low %v197_v22, %v201_v24 }
  0x4c   :  { %v135_v30 = vcombine.low %v199_v23, %v203_v27 }
  0x4d   :  { %v138_v32 = vmul.f32 %v134_v29, %v78_v41 }
  0x4e   :  { %v139_v33 = vmul.f32 %v135_v30, %v79_v42 }
  0x94   :  { %v143_v31 = vpop.permute.xlu0 %142 }
  0x95   :  { %v150_v34 = vrot.slane %v143_v31, %v149_v28 }
  0x97   :  { %v152_v36 = vmul.f32 %v150_v34, %v138_v32  ;;  %v153_v37 = vmul.f32 %v150_v34, %v139_v33 }
  0x98   :  { %v157_v35 = vpop.permute.xlu0 %156 }
  0x99   :  { %v164_v38 = vrot.slane %v157_v35, %v149_v28 }
  0x9b   :  { %v166_v39 = vadd.f32 %v164_v38, %v152_v36  ;;  %v167_v40 = vadd.f32 %v164_v38, %v153_v37 }
  0x9d   :  { %168 = vst [vmem:[#allocation5] sm:$0xff] %v166_v39  ;;  %169 = vst [vmem:[#allocation5 + $0x8] sm:$0xff] %v167_v40 }
  0x9e   :  { %237 = shalt.err (!%p234_p12)
}
  0x9f   :  { %s238_s5 = scalar_lea.hbm %s325_s3, 256 }
  0xa0   :  { %p239_p13 = scmp.ne.s32.totalorder %s325_s3, %s238_s5  ;;  %p242_p0 = scmp.lt.u32.totalorder %s238_s5, %s325_s3 }
  0xa2   :  { %p244_p1 = pnand %p242_p0, %p239_p13 }
  0xa4   :  { %247 = shalt.err (!%p244_p1)
}
  0xa5   :  { %181 = dma.vmem_to_hbm [thread:$0]  %s176_s1, 256, %s325_s3, [#allocation4], %s253_s22, %s253_s22, %s254_s23  }
  0xa6   :  { %250 = dma.done.wait [#allocation4], 256  }
  0xa7   :  { %251 = vsyncadd [#allocation4], 4294967040 }
  0xa8   :  { %185 = vsyncpa [#allocation3], 1 }
  0xa9   :  { %186 = vsyncpa [#allocation4], 1 }

</bundles_post_ra>
